<compile_context>
chip_gen: v6e
topology: v6e:2x2x1
jax: 0.10.0
libtpu: 0.0.40
codegen_flags: <defaults>
</compile_context>

<pallas_src>
import functools

import numpy as np
import jax
import jax.numpy as jnp
from jax.experimental import pallas as pl
from jax.experimental.pallas import tpu as pltpu


# ----------------------------------------------------------------------------
# Shared per-image computation: coherence map of one (C, H*W) plane.
# ----------------------------------------------------------------------------
def _coherence_map(w_ref, valid_ref, x_ref, H, W, eps):
    """Returns the (1, H*W) float32 coherence map for the current batch image."""
    HW = H * W
    x = x_ref[0].astype(jnp.float32)        # (C, HW)   lane-dense
    cw = w_ref[0].astype(jnp.float32)       # (C, 1)    cos weights
    sw = w_ref[1].astype(jnp.float32)       # (C, 1)    sin weights

    # channel-weighted reduction (VPU multiply + sublane reduce, exact f32)
    cos_o = jnp.sum(x * cw, axis=0, keepdims=True)       # (1, HW)
    sin_o = jnp.sum(x * sw, axis=0, keepdims=True)       # (1, HW)
    mod_o = jnp.sqrt(cos_o * cos_o + sin_o * sin_o)

    valid = valid_ref[...]                  # (9, HW) 0/1 border masks

    def box3(a):
        # zero-padded 3x3 mean filter, done in the flat (row-major) layout:
        # neighbor (h+dy, w+dx) == flat offset dy*W+dx, border taps masked out.
        out = jnp.zeros_like(a)
        k = 0
        for dy in (-1, 0, 1):
            for dx in (-1, 0, 1):
                shift = (-(dy * W + dx)) % HW
                shifted = a if shift == 0 else pltpu.roll(a, shift=shift, axis=1)
                out = out + valid[k:k + 1, :] * shifted
                k += 1
        return out * jnp.float32(1.0 / 9.0)

    cos_c = box3(cos_o)
    sin_c = box3(sin_o)
    mod_c = box3(mod_o)
    return jnp.sqrt(sin_c * sin_c + cos_c * cos_c) / jnp.maximum(
        mod_c, jnp.float32(eps))


# ----------------------------------------------------------------------------
# Kernel 1: unmasked path  ->  loss = 1 / clamp_min(mean(coherence), eps) - 1
# ----------------------------------------------------------------------------
def _coherence_unmasked_kernel(w_ref, valid_ref, x_ref, o_ref, acc_ref,
                               *, H, W, eps, inv_count):
    b = pl.program_id(0)

    @pl.when(b == 0)
    def _():
        acc_ref[...] = jnp.zeros_like(acc_ref)

    acc_ref[...] += _coherence_map(w_ref, valid_ref, x_ref, H, W, eps)

    @pl.when(b == pl.num_programs(0) - 1)
    def _():
        mean = jnp.sum(acc_ref[...]) * jnp.float32(inv_count)
        o_ref[0, 0] = (jnp.float32(1.0) / jnp.maximum(mean, jnp.float32(eps))
                       - jnp.float32(1.0))


# ----------------------------------------------------------------------------
# Kernel 2: masked path  ->  loss = sum(mask) / clamp_min(sum(coh*mask), eps) - 1
# ----------------------------------------------------------------------------
def _coherence_masked_kernel(w_ref, valid_ref, x_ref, m_ref, o_ref,
                             acc_m_ref, acc_cm_ref, *, H, W, eps):
    b = pl.program_id(0)

    @pl.when(b == 0)
    def _():
        acc_m_ref[...] = jnp.zeros_like(acc_m_ref)
        acc_cm_ref[...] = jnp.zeros_like(acc_cm_ref)

    coh = _coherence_map(w_ref, valid_ref, x_ref, H, W, eps)
    m = m_ref[0].astype(jnp.float32)                       # (1, HW)
    acc_m_ref[...] += m
    acc_cm_ref[...] += coh * m

    @pl.when(b == pl.num_programs(0) - 1)
    def _():
        mask_sum = jnp.sum(acc_m_ref[...])
        coh_sum = jnp.maximum(jnp.sum(acc_cm_ref[...]), jnp.float32(eps))
        o_ref[0, 0] = mask_sum / coh_sum - jnp.float32(1.0)


# ----------------------------------------------------------------------------
# Wrapper: reproduces CoherenceLoss.forward(pt, mask=None)
# ----------------------------------------------------------------------------
def coherence_loss(pt, mask=None, ang_stride=2, eps=1e-6):
    assert pt.ndim == 4, "pt must be (B, C, H, W)"
    B, C, H, W = pt.shape
    HW = H * W

    # angle-bin weights (the module's cos2angle / sin2angle buffers) -> (2, C, 1)
    ang = (np.arange(ang_stride / 2.0, 180.0, ang_stride, dtype=np.float32)
           / 90.0) * np.float32(np.pi)
    assert ang.shape[0] == C, (
        f"pt has {C} channels but ang_stride={ang_stride} implies {ang.shape[0]}")
    w = jnp.asarray(np.stack([np.cos(ang), np.sin(ang)], axis=0)[:, :, None],
                    dtype=jnp.float32)

    # 0/1 validity masks for the 9 taps of the zero-padded 3x3 box filter
    hh, ww = np.meshgrid(np.arange(H), np.arange(W), indexing="ij")
    taps = []
    for dy in (-1, 0, 1):
        for dx in (-1, 0, 1):
            ok = (hh + dy >= 0) & (hh + dy < H) & (ww + dx >= 0) & (ww + dx < W)
            taps.append(ok.reshape(-1))
    valid = jnp.asarray(np.stack(taps, axis=0).astype(np.float32))     # (9, HW)

    x3 = pt.reshape(B, C, HW)                  # lane-dense minor dim

    w_spec = pl.BlockSpec((2, C, 1), lambda b: (0, 0, 0))
    valid_spec = pl.BlockSpec((9, HW), lambda b: (0, 0))
    x_spec = pl.BlockSpec((1, C, HW), lambda b: (b, 0, 0))
    out_shape = jax.ShapeDtypeStruct((1, 1), jnp.float32)
    out_spec = pl.BlockSpec(memory_space=pltpu.SMEM)

    compiler_params = pltpu.CompilerParams(
        dimension_semantics=("arbitrary",),    # batch axis carries the accumulators
        vmem_limit_bytes=32 * 1024 * 1024)

    bytes_in = 4 * (B * C * HW + 9 * HW + 2 * C)
    flops = 4 * B * C * HW + 90 * B * HW
    transcendentals = 3 * B * HW

    if mask is None:
        loss = pl.pallas_call(
            functools.partial(_coherence_unmasked_kernel, H=H, W=W, eps=eps,
                              inv_count=1.0 / float(B * HW)),
            out_shape=out_shape,
            grid_spec=pltpu.PrefetchScalarGridSpec(
                num_scalar_prefetch=0,
                grid=(B,),
                in_specs=[w_spec, valid_spec, x_spec],
                out_specs=out_spec,
                scratch_shapes=[pltpu.VMEM((1, HW), jnp.float32)]),
            compiler_params=compiler_params,
            cost_estimate=pl.CostEstimate(
                flops=flops, transcendentals=transcendentals,
                bytes_accessed=bytes_in + 4),
        )(w, valid, x3)
        return loss[0, 0]

    m = mask
    if m.dtype == jnp.bool_:
        m = m.astype(jnp.float32)
    m3 = m.reshape(B, 1, HW)
    m_spec = pl.BlockSpec((1, 1, HW), lambda b: (b, 0, 0))
    loss = pl.pallas_call(
        functools.partial(_coherence_masked_kernel, H=H, W=W, eps=eps),
        out_shape=out_shape,
        grid_spec=pltpu.PrefetchScalarGridSpec(
            num_scalar_prefetch=0,
            grid=(B,),
            in_specs=[w_spec, valid_spec, x_spec, m_spec],
            out_specs=out_spec,
            scratch_shapes=[pltpu.VMEM((1, HW), jnp.float32),
                            pltpu.VMEM((1, HW), jnp.float32)]),
        compiler_params=compiler_params,
        cost_estimate=pl.CostEstimate(
            flops=flops + 2 * B * HW, transcendentals=transcendentals,
            bytes_accessed=bytes_in + 4 * B * HW + 4),
    )(w, valid, x3, m3)
    return loss[0, 0]


# ----------------------------------------------------------------------------
# Pure-JAX reference (mirrors the PyTorch forward; clamp_min == jnp.maximum)
# ----------------------------------------------------------------------------
def coherence_loss_ref(pt, mask=None, ang_stride=2, eps=1e-6):
    B, C, H, W = pt.shape
    ang = (jnp.arange(ang_stride / 2.0, 180.0, ang_stride, dtype=jnp.float32)
           / 90.0) * jnp.float32(np.pi)
    cosw = jnp.cos(ang).reshape(1, C, 1, 1)
    sinw = jnp.sin(ang).reshape(1, C, 1, 1)
    ptf = pt.astype(jnp.float32)
    cos_o = (ptf * cosw).sum(axis=1, keepdims=True)
    sin_o = (ptf * sinw).sum(axis=1, keepdims=True)
    mod_o = jnp.sqrt(sin_o ** 2 + cos_o ** 2)

    def box3(a):
        ap = jnp.pad(a, ((0, 0), (0, 0), (1, 1), (1, 1)))
        out = jnp.zeros_like(a)
        for dy in range(3):
            for dx in range(3):
                out = out + ap[:, :, dy:dy + H, dx:dx + W]
        return out * (1.0 / 9.0)

    cos_c, sin_c, mod_c = box3(cos_o), box3(sin_o), box3(mod_o)
    coherence = jnp.sqrt(sin_c ** 2 + cos_c ** 2) / jnp.maximum(mod_c, eps)
    if mask is not None:
        m = mask.astype(jnp.float32).reshape(B, 1, H, W)
        return m.sum() / jnp.maximum((coherence * m).sum(), eps) - 1.0
    return 1.0 / jnp.maximum(coherence.mean(), eps) - 1.0


if __name__ == "__main__":
    key = jax.random.PRNGKey(0)
    k1, k2 = jax.random.split(key)

    ANG_STRIDE = 2
    B, C, H, W = 2, 180 // ANG_STRIDE, 16, 16     # C = 90 angle bins (module default)
    logits = jax.random.normal(k1, (B, C, H, W), dtype=jnp.float32)
    pt = jax.nn.softmax(logits, axis=1)           # per-pixel orientation distribution
    mask = (jax.random.uniform(k2, (B, 1, H, W)) > 0.4).astype(jnp.float32)

    # unmasked path
    out_unmasked = jax.block_until_ready(coherence_loss(pt, ang_stride=ANG_STRIDE))
    ref_unmasked = coherence_loss_ref(pt, ang_stride=ANG_STRIDE)
    assert jnp.allclose(out_unmasked, ref_unmasked, rtol=1e-4, atol=1e-6), (
        out_unmasked, ref_unmasked)

    # masked path
    out_masked = jax.block_until_ready(coherence_loss(pt, mask, ang_stride=ANG_STRIDE))
    ref_masked = coherence_loss_ref(pt, mask, ang_stride=ANG_STRIDE)
    assert jnp.allclose(out_masked, ref_masked, rtol=1e-4, atol=1e-6), (
        out_masked, ref_masked)

    print("KERNEL_OK")
</pallas_src>

<mosaic_0001>
module attributes {stable_mosaic.version = 11 : i64} {
  func.func @_coherence_unmasked_kernel(%arg0: i32, %arg1: memref<2x90x1xf32, #tpu.memory_space<vmem>>, %arg2: memref<9x256xf32, #tpu.memory_space<vmem>>, %arg3: memref<1x90x256xf32, #tpu.memory_space<vmem>>, %arg4: memref<1x1xf32, #tpu.memory_space<smem>>, %arg5: memref<1x256xf32, #tpu.memory_space<vmem>>) attributes {dimension_semantics = [#tpu.dimension_semantics<arbitrary>], iteration_bounds = array<i64: 2>, scalar_prefetch = 0 : i64, scratch_operands = 1 : i64, tpu.core_type = #tpu.core_type<tc>, window_params = [{pipeline_mode = #tpu.pipeline_mode<synchronous>, transform_indices = @transform_0, window_bounds = array<i64: 2, 90, 1>}, {pipeline_mode = #tpu.pipeline_mode<synchronous>, transform_indices = @transform_1, window_bounds = array<i64: 9, 256>}, {transform_indices = @transform_2, window_bounds = array<i64: 1, 90, 256>}, {transform_indices = @transform_3, window_bounds = array<i64: 1, 1>}]} {
    %c0_i32 = arith.constant 0 : i32
    %0 = arith.cmpi eq, %arg0, %c0_i32 : i32
    %1 = arith.extui %0 : i1 to i32
    %c0_i32_0 = arith.constant 0 : i32
    %2 = arith.cmpi ne, %1, %c0_i32_0 : i32
    scf.if %2 {
      %cst_40 = arith.constant 0.000000e+00 : f32
      %149 = vector.broadcast %cst_40 : f32 to vector<1x256xf32>
      %c0_41 = arith.constant 0 : index
      %c0_42 = arith.constant 0 : index
      %150 = vector.load %arg5[%c0_41, %c0_42] : memref<1x256xf32, #tpu.memory_space<vmem>>, vector<1x256xf32>
      tpu.vector_store %arg5[%c0_41, %c0_42], %149 {strides = array<i32>} : memref<1x256xf32, #tpu.memory_space<vmem>>, vector<1x256xf32>,
    } else {
    }
    %c0 = arith.constant 0 : index
    %c0_1 = arith.constant 0 : index
    %3 = vector.load %arg5[%c0, %c0_1] : memref<1x256xf32, #tpu.memory_space<vmem>>, vector<1x256xf32>
    %c0_2 = arith.constant 0 : index
    %c0_3 = arith.constant 0 : index
    %c0_4 = arith.constant 0 : index
    %4 = vector.load %arg3[%c0_2, %c0_3, %c0_4] : memref<1x90x256xf32, #tpu.memory_space<vmem>>, vector<1x90x256xf32>
    %5 = vector.shape_cast %4 : vector<1x90x256xf32> to vector<90x256xf32>
    %c0_5 = arith.constant 0 : index
    %c0_6 = arith.constant 0 : index
    %c0_7 = arith.constant 0 : index
    %6 = vector.load %arg1[%c0_5, %c0_6, %c0_7] : memref<2x90x1xf32, #tpu.memory_space<vmem>>, vector<1x90x1xf32>
    %7 = vector.shape_cast %6 : vector<1x90x1xf32> to vector<90x1xf32>
    %c1 = arith.constant 1 : index
    %c0_8 = arith.constant 0 : index
    %c0_9 = arith.constant 0 : index
    %8 = vector.load %arg1[%c1, %c0_8, %c0_9] : memref<2x90x1xf32, #tpu.memory_space<vmem>>, vector<1x90x1xf32>
    %9 = vector.shape_cast %8 : vector<1x90x1xf32> to vector<90x1xf32>
    %10 = vector.broadcast %7 : vector<90x1xf32> to vector<90x256xf32>
    %11 = arith.mulf %5, %10 : vector<90x256xf32>
    %cst = arith.constant dense<0.000000e+00> : vector<256xf32>
    %12 = vector.multi_reduction <add>, %11, %cst [0] : vector<90x256xf32> to vector<256xf32>
    %13 = vector.shape_cast %12 : vector<256xf32> to vector<1x256xf32>
    %14 = vector.broadcast %9 : vector<90x1xf32> to vector<90x256xf32>
    %15 = arith.mulf %5, %14 : vector<90x256xf32>
    %cst_10 = arith.constant dense<0.000000e+00> : vector<256xf32>
    %16 = vector.multi_reduction <add>, %15, %cst_10 [0] : vector<90x256xf32> to vector<256xf32>
    %17 = vector.shape_cast %16 : vector<256xf32> to vector<1x256xf32>
    %18 = arith.mulf %13, %13 : vector<1x256xf32>
    %19 = arith.mulf %17, %17 : vector<1x256xf32>
    %20 = arith.addf %18, %19 : vector<1x256xf32>
    %21 = math.sqrt %20 : vector<1x256xf32>
    %c0_11 = arith.constant 0 : index
    %c0_12 = arith.constant 0 : index
    %22 = vector.load %arg2[%c0_11, %c0_12] : memref<9x256xf32, #tpu.memory_space<vmem>>, vector<9x256xf32>
    %cst_13 = arith.constant 0.000000e+00 : f32
    %23 = vector.broadcast %cst_13 : f32 to vector<1x256xf32>
    %c17_i32 = arith.constant 17 : i32
    %24 = tpu.dynamic_rotate %13 by %c17_i32 dim 1 : vector<1x256xf32>, i32 -> vector<1x256xf32>
    %25 = vector.extract_strided_slice %22 {offsets = [0, 0], sizes = [1, 256], strides = [1, 1]} : vector<9x256xf32> to vector<1x256xf32>
    %26 = arith.mulf %25, %24 : vector<1x256xf32>
    %27 = arith.addf %23, %26 : vector<1x256xf32>
    %c16_i32 = arith.constant 16 : i32
    %28 = tpu.dynamic_rotate %13 by %c16_i32 dim 1 : vector<1x256xf32>, i32 -> vector<1x256xf32>
    %29 = vector.extract_strided_slice %22 {offsets = [1, 0], sizes = [1, 256], strides = [1, 1]} : vector<9x256xf32> to vector<1x256xf32>
    %30 = arith.mulf %29, %28 : vector<1x256xf32>
    %31 = arith.addf %27, %30 : vector<1x256xf32>
    %c15_i32 = arith.constant 15 : i32
    %32 = tpu.dynamic_rotate %13 by %c15_i32 dim 1 : vector<1x256xf32>, i32 -> vector<1x256xf32>
    %33 = vector.extract_strided_slice %22 {offsets = [2, 0], sizes = [1, 256], strides = [1, 1]} : vector<9x256xf32> to vector<1x256xf32>
    %34 = arith.mulf %33, %32 : vector<1x256xf32>
    %35 = arith.addf %31, %34 : vector<1x256xf32>
    %c1_i32 = arith.constant 1 : i32
    %36 = tpu.dynamic_rotate %13 by %c1_i32 dim 1 : vector<1x256xf32>, i32 -> vector<1x256xf32>
    %37 = vector.extract_strided_slice %22 {offsets = [3, 0], sizes = [1, 256], strides = [1, 1]} : vector<9x256xf32> to vector<1x256xf32>
    %38 = arith.mulf %37, %36 : vector<1x256xf32>
    %39 = arith.addf %35, %38 : vector<1x256xf32>
    %40 = vector.extract_strided_slice %22 {offsets = [4, 0], sizes = [1, 256], strides = [1, 1]} : vector<9x256xf32> to vector<1x256xf32>
    %41 = arith.mulf %40, %13 : vector<1x256xf32>
    %42 = arith.addf %39, %41 : vector<1x256xf32>
    %c255_i32 = arith.constant 255 : i32
    %43 = tpu.dynamic_rotate %13 by %c255_i32 dim 1 : vector<1x256xf32>, i32 -> vector<1x256xf32>
    %44 = vector.extract_strided_slice %22 {offsets = [5, 0], sizes = [1, 256], strides = [1, 1]} : vector<9x256xf32> to vector<1x256xf32>
    %45 = arith.mulf %44, %43 : vector<1x256xf32>
    %46 = arith.addf %42, %45 : vector<1x256xf32>
    %c241_i32 = arith.constant 241 : i32
    %47 = tpu.dynamic_rotate %13 by %c241_i32 dim 1 : vector<1x256xf32>, i32 -> vector<1x256xf32>
    %48 = vector.extract_strided_slice %22 {offsets = [6, 0], sizes = [1, 256], strides = [1, 1]} : vector<9x256xf32> to vector<1x256xf32>
    %49 = arith.mulf %48, %47 : vector<1x256xf32>
    %50 = arith.addf %46, %49 : vector<1x256xf32>
    %c240_i32 = arith.constant 240 : i32
    %51 = tpu.dynamic_rotate %13 by %c240_i32 dim 1 : vector<1x256xf32>, i32 -> vector<1x256xf32>
    %52 = vector.extract_strided_slice %22 {offsets = [7, 0], sizes = [1, 256], strides = [1, 1]} : vector<9x256xf32> to vector<1x256xf32>
    %53 = arith.mulf %52, %51 : vector<1x256xf32>
    %54 = arith.addf %50, %53 : vector<1x256xf32>
    %c239_i32 = arith.constant 239 : i32
    %55 = tpu.dynamic_rotate %13 by %c239_i32 dim 1 : vector<1x256xf32>, i32 -> vector<1x256xf32>
    %56 = vector.extract_strided_slice %22 {offsets = [8, 0], sizes = [1, 256], strides = [1, 1]} : vector<9x256xf32> to vector<1x256xf32>
    %57 = arith.mulf %56, %55 : vector<1x256xf32>
    %58 = arith.addf %54, %57 : vector<1x256xf32>
    %cst_14 = arith.constant 0.111111112 : f32
    %59 = vector.broadcast %cst_14 : f32 to vector<1x256xf32>
    %60 = arith.mulf %58, %59 : vector<1x256xf32>
    %cst_15 = arith.constant 0.000000e+00 : f32
    %61 = vector.broadcast %cst_15 : f32 to vector<1x256xf32>
    %c17_i32_16 = arith.constant 17 : i32
    %62 = tpu.dynamic_rotate %17 by %c17_i32_16 dim 1 : vector<1x256xf32>, i32 -> vector<1x256xf32>
    %63 = vector.extract_strided_slice %22 {offsets = [0, 0], sizes = [1, 256], strides = [1, 1]} : vector<9x256xf32> to vector<1x256xf32>
    %64 = arith.mulf %63, %62 : vector<1x256xf32>
    %65 = arith.addf %61, %64 : vector<1x256xf32>
    %c16_i32_17 = arith.constant 16 : i32
    %66 = tpu.dynamic_rotate %17 by %c16_i32_17 dim 1 : vector<1x256xf32>, i32 -> vector<1x256xf32>
    %67 = vector.extract_strided_slice %22 {offsets = [1, 0], sizes = [1, 256], strides = [1, 1]} : vector<9x256xf32> to vector<1x256xf32>
    %68 = arith.mulf %67, %66 : vector<1x256xf32>
    %69 = arith.addf %65, %68 : vector<1x256xf32>
    %c15_i32_18 = arith.constant 15 : i32
    %70 = tpu.dynamic_rotate %17 by %c15_i32_18 dim 1 : vector<1x256xf32>, i32 -> vector<1x256xf32>
    %71 = vector.extract_strided_slice %22 {offsets = [2, 0], sizes = [1, 256], strides = [1, 1]} : vector<9x256xf32> to vector<1x256xf32>
    %72 = arith.mulf %71, %70 : vector<1x256xf32>
    %73 = arith.addf %69, %72 : vector<1x256xf32>
    %c1_i32_19 = arith.constant 1 : i32
    %74 = tpu.dynamic_rotate %17 by %c1_i32_19 dim 1 : vector<1x256xf32>, i32 -> vector<1x256xf32>
    %75 = vector.extract_strided_slice %22 {offsets = [3, 0], sizes = [1, 256], strides = [1, 1]} : vector<9x256xf32> to vector<1x256xf32>
    %76 = arith.mulf %75, %74 : vector<1x256xf32>
    %77 = arith.addf %73, %76 : vector<1x256xf32>
    %78 = vector.extract_strided_slice %22 {offsets = [4, 0], sizes = [1, 256], strides = [1, 1]} : vector<9x256xf32> to vector<1x256xf32>
    %79 = arith.mulf %78, %17 : vector<1x256xf32>
    %80 = arith.addf %77, %79 : vector<1x256xf32>
    %c255_i32_20 = arith.constant 255 : i32
    %81 = tpu.dynamic_rotate %17 by %c255_i32_20 dim 1 : vector<1x256xf32>, i32 -> vector<1x256xf32>
    %82 = vector.extract_strided_slice %22 {offsets = [5, 0], sizes = [1, 256], strides = [1, 1]} : vector<9x256xf32> to vector<1x256xf32>
    %83 = arith.mulf %82, %81 : vector<1x256xf32>
    %84 = arith.addf %80, %83 : vector<1x256xf32>
    %c241_i32_21 = arith.constant 241 : i32
    %85 = tpu.dynamic_rotate %17 by %c241_i32_21 dim 1 : vector<1x256xf32>, i32 -> vector<1x256xf32>
    %86 = vector.extract_strided_slice %22 {offsets = [6, 0], sizes = [1, 256], strides = [1, 1]} : vector<9x256xf32> to vector<1x256xf32>
    %87 = arith.mulf %86, %85 : vector<1x256xf32>
    %88 = arith.addf %84, %87 : vector<1x256xf32>
    %c240_i32_22 = arith.constant 240 : i32
    %89 = tpu.dynamic_rotate %17 by %c240_i32_22 dim 1 : vector<1x256xf32>, i32 -> vector<1x256xf32>
    %90 = vector.extract_strided_slice %22 {offsets = [7, 0], sizes = [1, 256], strides = [1, 1]} : vector<9x256xf32> to vector<1x256xf32>
    %91 = arith.mulf %90, %89 : vector<1x256xf32>
    %92 = arith.addf %88, %91 : vector<1x256xf32>
    %c239_i32_23 = arith.constant 239 : i32
    %93 = tpu.dynamic_rotate %17 by %c239_i32_23 dim 1 : vector<1x256xf32>, i32 -> vector<1x256xf32>
    %94 = vector.extract_strided_slice %22 {offsets = [8, 0], sizes = [1, 256], strides = [1, 1]} : vector<9x256xf32> to vector<1x256xf32>
    %95 = arith.mulf %94, %93 : vector<1x256xf32>
    %96 = arith.addf %92, %95 : vector<1x256xf32>
    %cst_24 = arith.constant 0.111111112 : f32
    %97 = vector.broadcast %cst_24 : f32 to vector<1x256xf32>
    %98 = arith.mulf %96, %97 : vector<1x256xf32>
    %cst_25 = arith.constant 0.000000e+00 : f32
    %99 = vector.broadcast %cst_25 : f32 to vector<1x256xf32>
    %c17_i32_26 = arith.constant 17 : i32
    %100 = tpu.dynamic_rotate %21 by %c17_i32_26 dim 1 : vector<1x256xf32>, i32 -> vector<1x256xf32>
    %101 = vector.extract_strided_slice %22 {offsets = [0, 0], sizes = [1, 256], strides = [1, 1]} : vector<9x256xf32> to vector<1x256xf32>
    %102 = arith.mulf %101, %100 : vector<1x256xf32>
    %103 = arith.addf %99, %102 : vector<1x256xf32>
    %c16_i32_27 = arith.constant 16 : i32
    %104 = tpu.dynamic_rotate %21 by %c16_i32_27 dim 1 : vector<1x256xf32>, i32 -> vector<1x256xf32>
    %105 = vector.extract_strided_slice %22 {offsets = [1, 0], sizes = [1, 256], strides = [1, 1]} : vector<9x256xf32> to vector<1x256xf32>
    %106 = arith.mulf %105, %104 : vector<1x256xf32>
    %107 = arith.addf %103, %106 : vector<1x256xf32>
    %c15_i32_28 = arith.constant 15 : i32
    %108 = tpu.dynamic_rotate %21 by %c15_i32_28 dim 1 : vector<1x256xf32>, i32 -> vector<1x256xf32>
    %109 = vector.extract_strided_slice %22 {offsets = [2, 0], sizes = [1, 256], strides = [1, 1]} : vector<9x256xf32> to vector<1x256xf32>
    %110 = arith.mulf %109, %108 : vector<1x256xf32>
    %111 = arith.addf %107, %110 : vector<1x256xf32>
    %c1_i32_29 = arith.constant 1 : i32
    %112 = tpu.dynamic_rotate %21 by %c1_i32_29 dim 1 : vector<1x256xf32>, i32 -> vector<1x256xf32>
    %113 = vector.extract_strided_slice %22 {offsets = [3, 0], sizes = [1, 256], strides = [1, 1]} : vector<9x256xf32> to vector<1x256xf32>
    %114 = arith.mulf %113, %112 : vector<1x256xf32>
    %115 = arith.addf %111, %114 : vector<1x256xf32>
    %116 = vector.extract_strided_slice %22 {offsets = [4, 0], sizes = [1, 256], strides = [1, 1]} : vector<9x256xf32> to vector<1x256xf32>
    %117 = arith.mulf %116, %21 : vector<1x256xf32>
    %118 = arith.addf %115, %117 : vector<1x256xf32>
    %c255_i32_30 = arith.constant 255 : i32
    %119 = tpu.dynamic_rotate %21 by %c255_i32_30 dim 1 : vector<1x256xf32>, i32 -> vector<1x256xf32>
    %120 = vector.extract_strided_slice %22 {offsets = [5, 0], sizes = [1, 256], strides = [1, 1]} : vector<9x256xf32> to vector<1x256xf32>
    %121 = arith.mulf %120, %119 : vector<1x256xf32>
    %122 = arith.addf %118, %121 : vector<1x256xf32>
    %c241_i32_31 = arith.constant 241 : i32
    %123 = tpu.dynamic_rotate %21 by %c241_i32_31 dim 1 : vector<1x256xf32>, i32 -> vector<1x256xf32>
    %124 = vector.extract_strided_slice %22 {offsets = [6, 0], sizes = [1, 256], strides = [1, 1]} : vector<9x256xf32> to vector<1x256xf32>
    %125 = arith.mulf %124, %123 : vector<1x256xf32>
    %126 = arith.addf %122, %125 : vector<1x256xf32>
    %c240_i32_32 = arith.constant 240 : i32
    %127 = tpu.dynamic_rotate %21 by %c240_i32_32 dim 1 : vector<1x256xf32>, i32 -> vector<1x256xf32>
    %128 = vector.extract_strided_slice %22 {offsets = [7, 0], sizes = [1, 256], strides = [1, 1]} : vector<9x256xf32> to vector<1x256xf32>
    %129 = arith.mulf %128, %127 : vector<1x256xf32>
    %130 = arith.addf %126, %129 : vector<1x256xf32>
    %c239_i32_33 = arith.constant 239 : i32
    %131 = tpu.dynamic_rotate %21 by %c239_i32_33 dim 1 : vector<1x256xf32>, i32 -> vector<1x256xf32>
    %132 = vector.extract_strided_slice %22 {offsets = [8, 0], sizes = [1, 256], strides = [1, 1]} : vector<9x256xf32> to vector<1x256xf32>
    %133 = arith.mulf %132, %131 : vector<1x256xf32>
    %134 = arith.addf %130, %133 : vector<1x256xf32>
    %cst_34 = arith.constant 0.111111112 : f32
    %135 = vector.broadcast %cst_34 : f32 to vector<1x256xf32>
    %136 = arith.mulf %134, %135 : vector<1x256xf32>
    %137 = arith.mulf %98, %98 : vector<1x256xf32>
    %138 = arith.mulf %60, %60 : vector<1x256xf32>
    %139 = arith.addf %137, %138 : vector<1x256xf32>
    %140 = math.sqrt %139 : vector<1x256xf32>
    %cst_35 = arith.constant 9.99999997E-7 : f32
    %141 = vector.broadcast %cst_35 : f32 to vector<1x256xf32>
    %142 = arith.maximumf %136, %141 : vector<1x256xf32>
    %143 = arith.divf %140, %142 : vector<1x256xf32>
    %144 = arith.addf %3, %143 : vector<1x256xf32>
    %c0_36 = arith.constant 0 : index
    %c0_37 = arith.constant 0 : index
    %145 = vector.load %arg5[%c0_36, %c0_37] : memref<1x256xf32, #tpu.memory_space<vmem>>, vector<1x256xf32>
    tpu.vector_store %arg5[%c0_36, %c0_37], %144 {strides = array<i32>} : memref<1x256xf32, #tpu.memory_space<vmem>>, vector<1x256xf32>,
    %c1_i32_38 = arith.constant 1 : i32
    %146 = arith.cmpi eq, %arg0, %c1_i32_38 : i32
    %147 = arith.extui %146 : i1 to i32
    %c0_i32_39 = arith.constant 0 : i32
    %148 = arith.cmpi ne, %147, %c0_i32_39 : i32
    scf.if %148 {
      %c0_40 = arith.constant 0 : index
      %c0_41 = arith.constant 0 : index
      %149 = vector.load %arg5[%c0_40, %c0_41] : memref<1x256xf32, #tpu.memory_space<vmem>>, vector<1x256xf32>
      %150 = vector.shape_cast %149 : vector<1x256xf32> to vector<1x1x256xf32>
      %cst_42 = arith.constant dense<0.000000e+00> : vector<1xf32>
      %151 = vector.multi_reduction <add>, %150, %cst_42 [1, 2] : vector<1x1x256xf32> to vector<1xf32>
      %152 = vector.shape_cast %151 : vector<1xf32> to vector<1x1x1xf32>
      %153 = vector.extract %152[0, 0, 0] : f32 from vector<1x1x1xf32>
      %cst_43 = arith.constant 0.001953125 : f32
      %154 = arith.mulf %153, %cst_43 : f32
      %cst_44 = arith.constant 9.99999997E-7 : f32
      %155 = arith.maximumf %154, %cst_44 : f32
      %cst_45 = arith.constant 1.000000e+00 : f32
      %156 = arith.divf %cst_45, %155 : f32
      %cst_46 = arith.constant 1.000000e+00 : f32
      %157 = arith.subf %156, %cst_46 : f32
      %c0_47 = arith.constant 0 : index
      %c0_48 = arith.constant 0 : index
      %158 = memref.load %arg4[%c0_47, %c0_48] : memref<1x1xf32, #tpu.memory_space<smem>>
      memref.store %157, %arg4[%c0_47, %c0_48] : memref<1x1xf32, #tpu.memory_space<smem>>
    } else {
    }
    return
  }
  func.func @transform_0(%arg0: i32) -> (i32, i32, i32) {
    %c0_i32 = arith.constant 0 : i32
    %c0_i32_0 = arith.constant 0 : i32
    %c0_i32_1 = arith.constant 0 : i32
    %c0_i32_2 = arith.constant 0 : i32
    return %c0_i32, %c0_i32_0, %c0_i32_1 : i32, i32, i32
  }
  func.func @transform_1(%arg0: i32) -> (i32, i32) {
    %c0_i32 = arith.constant 0 : i32
    %c0_i32_0 = arith.constant 0 : i32
    %c0_i32_1 = arith.constant 0 : i32
    return %c0_i32, %c0_i32_0 : i32, i32
  }
  func.func @transform_2(%arg0: i32) -> (i32, i32, i32) {
    %c0_i32 = arith.constant 0 : i32
    %c0_i32_0 = arith.constant 0 : i32
    %c0_i32_1 = arith.constant 0 : i32
    return %arg0, %c0_i32, %c0_i32_0 : i32, i32, i32
  }
  func.func @transform_3(%arg0: i32) -> (i32, i32) {
    %c0_i32 = arith.constant 0 : i32
    %c0_i32_0 = arith.constant 0 : i32
    %c0_i32_1 = arith.constant 0 : i32
    return %c0_i32, %c0_i32_0 : i32, i32
  }
}

</mosaic_0001>

<bundles_post_ra>
// kernel: tpu_custom_call.1
= control target key start
LH: loop header
LB: loop body
LE: loop exit
PB: predicated region body
PF: predicated region fallthrough
CT: control target
= control target key end

     0   :  { %8 = vsyncpa [#allocation4], 0  ;;  %s1242_s12 = smov 0   ;;  %s1695_s0 = inlined_call_operand.vmem [shape: f32[2,90,1], index: 0, kind: input, shape index: {}]   ;;  %s1696_s1 = inlined_call_operand.vmem [shape: f32[9,256], index: 1, kind: input, shape index: {}]   ;;  %s1697_s2 = inlined_call_operand.vmem [shape: f32[2,90,256], index: 2, kind: input, shape index: {}]   ;;  %s1698_s3 = inlined_call_operand.hbm [shape: f32[1,1], index: 3, kind: output, shape index: {}]  }
   0x1 LB: > { %s1248_s13 = sadd.s32 4294967295, %s1207_s12   ;;  %p1118_p0 = scmp.ge.s32.totalorder %s1207_s12, 1  ;;  %s1207_s12 = sphi %s1242_s12, %s14_s12  }
   0x2   : > { %p133_p1 = scmp.lt.s32.totalorder %s1207_s12, 3 }
   0x4   : > { %p134_p2 = pnand %p1118_p0, %p133_p1 }
   0x5   : > { %p152_p3 = scmp.lt.s32.totalorder (!%p134_p2), %s1248_s13, 1  ;;  %p1120_p4 = scmp.ne.s32.totalorder (!%p134_p2), %s1248_s13, 0 }
   0x6   : > { %137 = sbr.rel (%p134_p2) target bundleno = 741 (0x2e5), region = 32 }
   0xb   : > { %s153_s14 = scalar_select %p152_p3, %s1248_s13, 1 }
   0xc   : > { %160 = sbr.rel (%p1120_p4) target bundleno = 21 (0x15), region = 36 }
   0xd   : > { %s1139_s15 = smul.u32 192, %s153_s14 }
   0xf   : > { %s1257_s18 = scalar_lea.vmem %s1697_s2, %s1139_s15 }
  0x11   : > { %v161_v0 = vlaneseq  ;;  %v1209_v1 = vmov 0.0  }
  0x13   : > { %vm163_vm0 = vcmp.lt.s32.totalorder %v161_v0, 256 }
  0x14   : > { %165 = vst.msk [vmem:[#allocation2] sm:$0x3] %vm163_vm0, %v1209_v1 }
  0x15 PF: > { %v1121_v2 = vld [vmem:[%s1695_s0 + $0x60] sm:$0xff]  ;;  %v1210_v4 = vmov 0   ;;  %v1122_v5 = vld [vmem:[%s1695_s0 + $0x68] sm:$0xff]  ;;  %v1123_v7 = vld [vmem:[%s1695_s0 + $0x70] sm:$0xff]  ;;  %vm310_vm1 = vcmask 1041408   ;;  %s1212_s19 = smov 15  }
  0x16   : > { %v191_v3 = vld [vmem:[%s1695_s0] sm:$0xff]  ;;  %1172 = vset.pattern.permute.xlu1 %v1210_v4  ;;  %1171 = vset.pattern.permute.xlu0 %v1210_v4  ;;  %v192_v6 = vld [vmem:[%s1695_s0 + $0x8] sm:$0xff]  ;;  %v193_v8 = vld [vmem:[%s1695_s0 + $0x10] sm:$0xff]  ;;  %s1213_s20 = smov 17   ;;  %s1214_s21 = smov 1  }
  0x17   : > { %339 = vperm.xlu1 %1172, %v1121_v2   ;;  %218 = vperm.xlu0 %1171, %v191_v3   ;;  %v1124_v9 = vld [vmem:[%s1695_s0 + $0x78] sm:$0xff]  ;;  %v1125_v11 = vld [vmem:[%s1695_s0 + $0x80] sm:$0xff]  ;;  %v1126_v13 = vld [vmem:[%s1695_s0 + $0x88] sm:$0xff]  ;;  %s1215_s22 = smov 127   ;;  %s1216_s23 = smov 113  }
  0x18   : > { %v194_v10 = vld [vmem:[%s1695_s0 + $0x18] sm:$0xff]  ;;  %v195_v12 = vld [vmem:[%s1695_s0 + $0x20] sm:$0xff]  ;;  %v196_v14 = vld [vmem:[%s1695_s0 + $0x28] sm:$0xff]  ;;  %s1217_s24 = smov 112   ;;  %s1218_s25 = smov 111  }
  0x19   : > { %v1127_v15 = vld [vmem:[%s1695_s0 + $0x90] sm:$0xff]  ;;  %v1128_v17 = vld [vmem:[%s1695_s0 + $0x98] sm:$0xff]  ;;  %v1129_v19 = vld [vmem:[%s1695_s0 + $0xa0] sm:$0xff]  ;;  %p1133_p5 = scmp.ne.s32.totalorder %s1248_s13, 1 }
  0x1a   : > { %v197_v16 = vld [vmem:[%s1695_s0 + $0x30] sm:$0xff]  ;;  %v198_v18 = vld [vmem:[%s1695_s0 + $0x38] sm:$0xff]  ;;  %v199_v20 = vld [vmem:[%s1695_s0 + $0x40] sm:$0xff]  ;;  %s1220_s9 = smov (!%p1133_p5), 1e-06  }
  0x1b   : > { %344 = vperm.xlu1 %1172, %v1122_v5   ;;  %223 = vperm.xlu0 %1171, %v192_v6   ;;  %v1130_v21 = vld [vmem:[%s1695_s0 + $0xa8] sm:$0xff]  ;;  %v1131_v23 = vld [vmem:[%s1695_s0 + $0xb0] sm:$0xff]  ;;  %v1132_v25 = vld [vmem:[%s1695_s0 + $0xb8] sm:$0x3] }
  0x1c   : > { %v200_v22 = vld [vmem:[%s1695_s0 + $0x48] sm:$0xff]  ;;  %v201_v24 = vld [vmem:[%s1695_s0 + $0x50] sm:$0xff]  ;;  %v202_v26 = vld [vmem:[%s1695_s0 + $0x58] sm:$0x3] }
  0x1d   : > { %v169_v37 = vld [vmem:[%s1257_s18 + $0x10] sm:$0xff]  ;;  %v170_v38 = vld [vmem:[%s1257_s18 + $0x18] sm:$0xff]  ;;  %v167_v39 = vld [vmem:[%s1257_s18] sm:$0xff] }
  0x1e   : > { %v168_v40 = vld [vmem:[%s1257_s18 + $0x8] sm:$0xff]  ;;  %v171_v43 = vld [vmem:[%s1257_s18 + $0x20] sm:$0xff]  ;;  %v173_v57 = vld [vmem:[%s1257_s18 + $0x30] sm:$0xff] }
  0x1f   : > { %349 = vperm.xlu1 %1172, %v1123_v7   ;;  %228 = vperm.xlu0 %1171, %v193_v8   ;;  %v172_v44 = vld [vmem:[%s1257_s18 + $0x28] sm:$0xff]  ;;  %v174_v58 = vld [vmem:[%s1257_s18 + $0x38] sm:$0xff]  ;;  %v175_v63 = vld [vmem:[%s1257_s18 + $0x40] sm:$0xff] }
  0x20   : > { %v176_v0 = vld [vmem:[%s1257_s18 + $0x48] sm:$0xff] }
  0x23   : > { %354 = vperm.xlu1 %1172, %v1124_v9   ;;  %233 = vperm.xlu0 %1171, %v194_v10  }
  0x27   : > { %359 = vperm.xlu1 %1172, %v1125_v11   ;;  %238 = vperm.xlu0 %1171, %v195_v12  }
  0x2b   : > { %364 = vperm.xlu1 %1172, %v1126_v13   ;;  %243 = vperm.xlu0 %1171, %v196_v14  }
  0x2f   : > { %369 = vperm.xlu1 %1172, %v1127_v15   ;;  %248 = vperm.xlu0 %1171, %v197_v16   ;;  %v177_v15 = vld [vmem:[%s1257_s18 + $0x50] sm:$0xff]  ;;  %v178_v16 = vld [vmem:[%s1257_s18 + $0x58] sm:$0xff] }
  0x33   : > { %374 = vperm.xlu1 %1172, %v1128_v17   ;;  %253 = vperm.xlu0 %1171, %v198_v18  }
  0x37   : > { %379 = vperm.xlu1 %1172, %v1129_v19   ;;  %258 = vperm.xlu0 %1171, %v199_v20  }
  0x3b   : > { %384 = vperm.xlu1 %1172, %v1130_v21   ;;  %263 = vperm.xlu0 %1171, %v200_v22  }
  0x3f   : > { %389 = vperm.xlu1 %1172, %v1131_v23   ;;  %268 = vperm.xlu0 %1171, %v201_v24   ;;  %v179_v23 = vld [vmem:[%s1257_s18 + $0x60] sm:$0xff]  ;;  %v180_v24 = vld [vmem:[%s1257_s18 + $0x68] sm:$0xff] }
  0x43   : > { %394 = vperm.xlu1 %1172, %v1132_v25   ;;  %273 = vperm.xlu0 %1171, %v202_v26  }
  0x92   : > { %v340_v27 = vpop.permute.xlu1 %339  ;;  %v219_v28 = vpop.permute.xlu0 %218 }
  0x93   : > { %v397_v41 = vmul.f32 %v340_v27, %v167_v39  ;;  %v398_v42 = vmul.f32 %v340_v27, %v168_v40  ;;  %v276_v51 = vmul.f32 %v219_v28, %v167_v39  ;;  %v277_v52 = vmul.f32 %v219_v28, %v168_v40 }
  0x96   : > { %v345_v29 = vpop.permute.xlu1 %344  ;;  %v224_v30 = vpop.permute.xlu0 %223 }
  0x97   : > { %v399_v45 = vmul.f32 %v345_v29, %v169_v37  ;;  %v400_v46 = vmul.f32 %v345_v29, %v170_v38  ;;  %v278_v47 = vmul.f32 %v224_v30, %v169_v37  ;;  %v279_v48 = vmul.f32 %v224_v30, %v170_v38  ;;  %v181_v37 = vld [vmem:[%s1257_s18 + $0x70] sm:$0xff]  ;;  %v182_v38 = vld [vmem:[%s1257_s18 + $0x78] sm:$0xff] }
  0x99   : > { %v421_v59 = vadd.f32 %v399_v45, %v397_v41  ;;  %v439_v60 = vadd.f32 %v400_v46, %v398_v42  ;;  %v300_v61 = vadd.f32 %v278_v47, %v276_v51  ;;  %v319_v62 = vadd.f32 %v279_v48, %v277_v52  ;;  %v183_v45 = vld [vmem:[%s1257_s18 + $0x80] sm:$0xff]  ;;  %v184_v46 = vld [vmem:[%s1257_s18 + $0x88] sm:$0xff] }
  0x9a   : > { %v350_v31 = vpop.permute.xlu1 %349  ;;  %v229_v32 = vpop.permute.xlu0 %228 }
  0x9b   : > { %v401_v53 = vmul.f32 %v350_v31, %v171_v43  ;;  %v402_v54 = vmul.f32 %v350_v31, %v172_v44  ;;  %v280_v55 = vmul.f32 %v229_v32, %v171_v43  ;;  %v281_v56 = vmul.f32 %v229_v32, %v172_v44 }
  0x9d   : > { %v422_v7 = vadd.f32 %v421_v59, %v401_v53  ;;  %v440_v8 = vadd.f32 %v439_v60, %v402_v54  ;;  %v301_v9 = vadd.f32 %v300_v61, %v280_v55  ;;  %v320_v10 = vadd.f32 %v319_v62, %v281_v56  ;;  %v185_v61 = vld [vmem:[%s1257_s18 + $0x90] sm:$0xff]  ;;  %v186_v62 = vld [vmem:[%s1257_s18 + $0x98] sm:$0xff] }
  0x9e   : > { %v355_v33 = vpop.permute.xlu1 %354  ;;  %v234_v34 = vpop.permute.xlu0 %233 }
  0x9f   : > { %v403_v3 = vmul.f32 %v355_v33, %v173_v57  ;;  %v404_v4 = vmul.f32 %v355_v33, %v174_v58  ;;  %v282_v5 = vmul.f32 %v234_v34, %v173_v57  ;;  %v283_v6 = vmul.f32 %v234_v34, %v174_v58 }
  0xa1   : > { %v423_v19 = vadd.f32 %v422_v7, %v403_v3  ;;  %v441_v20 = vadd.f32 %v440_v8, %v404_v4  ;;  %v302_v21 = vadd.f32 %v301_v9, %v282_v5  ;;  %v321_v22 = vadd.f32 %v320_v10, %v283_v6  ;;  %v187_v3 = vld [vmem:[%s1257_s18 + $0xa0] sm:$0xff]  ;;  %v188_v4 = vld [vmem:[%s1257_s18 + $0xa8] sm:$0xff] }
  0xa2   : > { %v360_v35 = vpop.permute.xlu1 %359  ;;  %v239_v36 = vpop.permute.xlu0 %238 }
  0xa3   : > { %v405_v11 = vmul.f32 %v360_v35, %v175_v63  ;;  %v406_v12 = vmul.f32 %v360_v35, %v176_v0  ;;  %v284_v13 = vmul.f32 %v239_v36, %v175_v63  ;;  %v285_v14 = vmul.f32 %v239_v36, %v176_v0 }
  0xa5   : > { %v424_v29 = vadd.f32 %v423_v19, %v405_v11  ;;  %v442_v30 = vadd.f32 %v441_v20, %v406_v12  ;;  %v303_v31 = vadd.f32 %v302_v21, %v284_v13  ;;  %v322_v32 = vadd.f32 %v321_v22, %v285_v14  ;;  %v189_v19 = vld [vmem:[%s1257_s18 + $0xb0] sm:$0x3]  ;;  %v190_v20 = vld [vmem:[%s1257_s18 + $0xb8] sm:$0x3]  ;;  %s1211_s18 = smov 16  }
  0xa6   : > { %v365_v49 = vpop.permute.xlu1 %364  ;;  %v244_v50 = vpop.permute.xlu0 %243 }
  0xa7   : > { %v407_v25 = vmul.f32 %v365_v49, %v177_v15  ;;  %v408_v26 = vmul.f32 %v365_v49, %v178_v16  ;;  %v286_v27 = vmul.f32 %v244_v50, %v177_v15  ;;  %v287_v28 = vmul.f32 %v244_v50, %v178_v16 }
  0xa9   : > { %v425_v41 = vadd.f32 %v424_v29, %v407_v25  ;;  %v443_v42 = vadd.f32 %v442_v30, %v408_v26  ;;  %v304_v43 = vadd.f32 %v303_v31, %v286_v27  ;;  %v323_v44 = vadd.f32 %v322_v32, %v287_v28 }
  0xaa   : > { %v370_v1 = vpop.permute.xlu1 %369  ;;  %v249_v2 = vpop.permute.xlu0 %248 }
  0xab   : > { %v409_v33 = vmul.f32 %v370_v1, %v179_v23  ;;  %v410_v34 = vmul.f32 %v370_v1, %v180_v24  ;;  %v288_v35 = vmul.f32 %v249_v2, %v179_v23  ;;  %v289_v36 = vmul.f32 %v249_v2, %v180_v24 }
  0xad   : > { %v426_v51 = vadd.f32 %v425_v41, %v409_v33  ;;  %v444_v52 = vadd.f32 %v443_v42, %v410_v34  ;;  %v305_v53 = vadd.f32 %v304_v43, %v288_v35  ;;  %v324_v54 = vadd.f32 %v323_v44, %v289_v36 }
  0xae   : > { %v375_v17 = vpop.permute.xlu1 %374  ;;  %v254_v18 = vpop.permute.xlu0 %253 }
  0xaf   : > { %v411_v47 = vmul.f32 %v375_v17, %v181_v37  ;;  %v412_v48 = vmul.f32 %v375_v17, %v182_v38  ;;  %v290_v49 = vmul.f32 %v254_v18, %v181_v37  ;;  %v291_v50 = vmul.f32 %v254_v18, %v182_v38 }
  0xb1   : > { %v427_v63 = vadd.f32 %v426_v51, %v411_v47  ;;  %v445_v0 = vadd.f32 %v444_v52, %v412_v48  ;;  %v306_v1 = vadd.f32 %v305_v53, %v290_v49  ;;  %v325_v2 = vadd.f32 %v324_v54, %v291_v50 }
  0xb2   : > { %v380_v39 = vpop.permute.xlu1 %379  ;;  %v259_v40 = vpop.permute.xlu0 %258 }
  0xb3   : > { %v413_v57 = vmul.f32 %v380_v39, %v183_v45  ;;  %v414_v58 = vmul.f32 %v380_v39, %v184_v46  ;;  %v292_v59 = vmul.f32 %v259_v40, %v183_v45  ;;  %v293_v60 = vmul.f32 %v259_v40, %v184_v46 }
  0xb5   : > { %v428_v11 = vadd.f32 %v427_v63, %v413_v57  ;;  %v446_v12 = vadd.f32 %v445_v0, %v414_v58  ;;  %v307_v13 = vadd.f32 %v306_v1, %v292_v59  ;;  %v326_v14 = vadd.f32 %v325_v2, %v293_v60 }
  0xb6   : > { %v385_v55 = vpop.permute.xlu1 %384  ;;  %v264_v56 = vpop.permute.xlu0 %263 }
  0xb7   : > { %v415_v5 = vmul.f32 %v385_v55, %v185_v61  ;;  %v416_v6 = vmul.f32 %v385_v55, %v186_v62  ;;  %v294_v7 = vmul.f32 %v264_v56, %v185_v61  ;;  %v295_v8 = vmul.f32 %v264_v56, %v186_v62 }
  0xb9   : > { %v429_v21 = vadd.f32 %v428_v11, %v415_v5  ;;  %v447_v22 = vadd.f32 %v446_v12, %v416_v6  ;;  %v308_v23 = vadd.f32 %v307_v13, %v294_v7  ;;  %v327_v24 = vadd.f32 %v326_v14, %v295_v8 }
  0xba   : > { %v390_v9 = vpop.permute.xlu1 %389  ;;  %v269_v10 = vpop.permute.xlu0 %268 }
  0xbb   : > { %v417_v15 = vmul.f32 %v390_v9, %v187_v3  ;;  %v418_v16 = vmul.f32 %v390_v9, %v188_v4  ;;  %v296_v17 = vmul.f32 %v269_v10, %v187_v3  ;;  %v297_v18 = vmul.f32 %v269_v10, %v188_v4 }
  0xbd   : > { %v430_v31 = vadd.f32 %v429_v21, %v417_v15  ;;  %v448_v32 = vadd.f32 %v447_v22, %v418_v16  ;;  %v309_v33 = vadd.f32 %v308_v23, %v296_v17  ;;  %v328_v34 = vadd.f32 %v327_v24, %v297_v18 }
  0xbe   : > { %v395_v25 = vpop.permute.xlu1 %394  ;;  %v274_v26 = vpop.permute.xlu0 %273 }
  0xbf   : > { %v419_v27 = vmul.f32 %v395_v25, %v189_v19  ;;  %v420_v28 = vmul.f32 %v395_v25, %v190_v20  ;;  %v298_v29 = vmul.f32 %v274_v26, %v189_v19  ;;  %v299_v30 = vmul.f32 %v274_v26, %v190_v20 }
  0xc0   : > { %v485_v19 = vlaneseq }
  0xc1   : > { %v431_v35 = vsel %vm310_vm1, %v419_v27, 0.0  ;;  %v449_v36 = vsel %vm310_vm1, %v420_v28, 0.0  ;;  %v311_v37 = vsel %vm310_vm1, %v298_v29, 0.0  ;;  %v329_v38 = vsel %vm310_vm1, %v299_v30, 0.0 }
  0xc2   : > { %v432_v39 = vadd.f32 %v431_v35, %v430_v31  ;;  %v450_v40 = vadd.f32 %v449_v36, %v448_v32  ;;  %v312_v41 = vadd.f32 %v311_v37, %v309_v33  ;;  %v330_v42 = vadd.f32 %v329_v38, %v328_v34 }
  0xc3   : > { %v1477_v20 = vand.u32 127, %v485_v19 }
  0xc4   : > { %v433_v43 = vrot.slane %v432_v39, 4  ;;  %v451_v44 = vrot.slane %v450_v40, 4  ;;  %v313_v45 = vrot.slane %v312_v41, 4  ;;  %v331_v46 = vrot.slane %v330_v42, 4 }
  0xc5   : > { %vm498_vm6 = vcmp.lt.s32.totalorder %v1477_v20, 16  ;;  %vm521_vm7 = vcmp.lt.s32.totalorder %v1477_v20, 15  ;;  %vm487_vm8 = vcmp.lt.s32.totalorder %v1477_v20, 17  ;;  %vm544_vm9 = vcmp.lt.s32.totalorder %v1477_v20, 1 }
  0xc6   : > { %v434_v47 = vadd.f32 %v433_v43, %v432_v39  ;;  %v452_v48 = vadd.f32 %v451_v44, %v450_v40  ;;  %v314_v49 = vadd.f32 %v313_v45, %v312_v41  ;;  %v332_v50 = vadd.f32 %v331_v46, %v330_v42  ;;  %v1496_v39 = vld [vmem:[%s1696_s1] sm:$0xff]  ;;  %v1501_v40 = vld [vmem:[%s1696_s1 + $0x8] sm:$0xff] }
  0xc7   : > { %vm577_vm10 = vcmp.lt.s32.totalorder %v1477_v20, 127  ;;  %vm600_vm11 = vcmp.lt.s32.totalorder %v1477_v20, 113  ;;  %vm623_vm12 = vcmp.lt.s32.totalorder %v1477_v20, 112  ;;  %vm646_vm13 = vcmp.lt.s32.totalorder %v1477_v20, 111 }
  0xc8   : > { %v435_v51 = vrot.slane %v434_v47, 2  ;;  %v453_v52 = vrot.slane %v452_v48, 2  ;;  %v315_v53 = vrot.slane %v314_v49, 2  ;;  %v333_v54 = vrot.slane %v332_v50, 2 }
  0xca   : > { %v436_v55 = vadd.f32 %v435_v51, %v434_v47  ;;  %v454_v56 = vadd.f32 %v453_v52, %v452_v48  ;;  %v316_v57 = vadd.f32 %v315_v53, %v314_v49  ;;  %v334_v58 = vadd.f32 %v333_v54, %v332_v50 }
  0xcc   : > { %v317_v59 = vrot.slane %v316_v57, 1  ;;  %v335_v60 = vrot.slane %v334_v58, 1  ;;  %v437_v61 = vrot.slane %v436_v55, 1  ;;  %v455_v62 = vrot.slane %v454_v56, 1 }
  0xce   : > { %v1360_v63 = vadd.f32 %v317_v59, %v316_v57  ;;  %v1362_v0 = vadd.f32 %v335_v60, %v334_v58  ;;  %v1368_v1 = vadd.f32 %v437_v61, %v436_v55  ;;  %v1370_v2 = vadd.f32 %v455_v62, %v454_v56 }
  0xd0   : > { %496 = vrot.lane.b32.xlu1 %v1362_v0, %s1211_s18  ;;  %494 = vrot.lane.b32.xlu0 %v1360_v63, %s1211_s18  ;;  %v458_v3 = vmul.f32 %v1362_v0, %v1362_v0  ;;  %v460_v4 = vmul.f32 %v1370_v2, %v1370_v2  ;;  %v457_v5 = vmul.f32 %v1360_v63, %v1360_v63 }
  0xd1   : > { %v459_v6 = vmul.f32 %v1368_v1, %v1368_v1 }
  0xd2   : > { %v462_v7 = vadd.f32 %v460_v4, %v458_v3 }
  0xd3   : > { %v461_v8 = vadd.f32 %v459_v6, %v457_v5 }
  0xd4   : > { %667 = vrot.lane.b32.xlu1 %v1370_v2, %s1211_s18  ;;  %665 = vrot.lane.b32.xlu0 %v1368_v1, %s1211_s18  ;;  %1173 = vrsqrt.f32 %v462_v7  ;;  %vm472_vm2 = vcmp.eq.f32.partialorder %v462_v7, inf  ;;  %v475_v15 = vand.u32 2147483648, %v462_v7  ;;  %vm474_vm4 = vcmp.eq.f32.partialorder %v462_v7, 0.0 }
  0xd5   : > { %1175 = vrsqrt.f32 %v461_v8  ;;  %vm465_vm3 = vcmp.eq.f32.partialorder %v461_v8, inf  ;;  %v468_v16 = vand.u32 2147483648, %v461_v8  ;;  %vm467_vm5 = vcmp.eq.f32.partialorder %v461_v8, 0.0 }
  0xd8   : > { %519 = vrot.lane.b32.xlu1 %v1362_v0, %s1212_s19  ;;  %517 = vrot.lane.b32.xlu0 %v1360_v63, %s1212_s19 }
  0xdc   : > { %689 = vrot.lane.b32.xlu1 %v1370_v2, %s1212_s19  ;;  %687 = vrot.lane.b32.xlu0 %v1368_v1, %s1212_s19 }
  0xe0   : > { %483 = vrot.lane.b32.xlu1 %v1362_v0, %s1213_s20  ;;  %481 = vrot.lane.b32.xlu0 %v1360_v63, %s1213_s20 }
  0xe1   : > { %v1174_v9 = vpop.eup %1173 }
  0xe2   : > { %v1176_v10 = vpop.eup %1175  ;;  %v471_v11 = vmul.f32 %v1174_v9, %v462_v7 }
  0xe3   : > { %v464_v12 = vmul.f32 %v1176_v10, %v461_v8 }
  0xe4   : > { %542 = vrot.lane.b32.xlu1 %v1362_v0, %s1214_s21  ;;  %540 = vrot.lane.b32.xlu0 %v1360_v63, %s1214_s21  ;;  %v473_v13 = vsel %vm472_vm2, %v462_v7, %v471_v11  ;;  %vm1030_vm2 = vcmp.lt.s32.totalorder %v485_v19, 256 }
  0xe5   : > { %v466_v14 = vsel %vm465_vm3, %v461_v8, %v464_v12  ;;  %v1440_v17 = vsel %vm474_vm4, %v475_v15, %v473_v13 }
  0xe6   : > { %v1442_v18 = vsel %vm467_vm5, %v468_v16, %v466_v14 }
  0xe8   : > { %657 = vrot.lane.b32.xlu1 %v1370_v2, %s1213_s20  ;;  %655 = vrot.lane.b32.xlu0 %v1368_v1, %s1213_s20 }
  0xec   : > { %711 = vrot.lane.b32.xlu1 %v1370_v2, %s1214_s21  ;;  %709 = vrot.lane.b32.xlu0 %v1368_v1, %s1214_s21 }
  0xf0   : > { %575 = vrot.lane.b32.xlu1 %v1362_v0, %s1215_s22  ;;  %573 = vrot.lane.b32.xlu0 %v1360_v63, %s1215_s22 }
  0xf4   : > { %743 = vrot.lane.b32.xlu1 %v1370_v2, %s1215_s22  ;;  %741 = vrot.lane.b32.xlu0 %v1368_v1, %s1215_s22 }
  0xf8   : > { %598 = vrot.lane.b32.xlu1 %v1362_v0, %s1216_s23  ;;  %596 = vrot.lane.b32.xlu0 %v1360_v63, %s1216_s23 }
  0xfc   : > { %765 = vrot.lane.b32.xlu1 %v1370_v2, %s1216_s23  ;;  %763 = vrot.lane.b32.xlu0 %v1368_v1, %s1216_s23 }
 0x100   : > { %621 = vrot.lane.b32.xlu1 %v1362_v0, %s1217_s24  ;;  %619 = vrot.lane.b32.xlu0 %v1360_v63, %s1217_s24 }
 0x104   : > { %787 = vrot.lane.b32.xlu1 %v1370_v2, %s1217_s24  ;;  %785 = vrot.lane.b32.xlu0 %v1368_v1, %s1217_s24 }
 0x108   : > { %644 = vrot.lane.b32.xlu1 %v1362_v0, %s1218_s25  ;;  %642 = vrot.lane.b32.xlu0 %v1360_v63, %s1218_s25 }
 0x10c   : > { %809 = vrot.lane.b32.xlu1 %v1370_v2, %s1218_s25  ;;  %807 = vrot.lane.b32.xlu0 %v1368_v1, %s1218_s25 }
 0x110   : > { %831 = vrot.lane.b32.xlu1 %v1440_v17, %s1211_s18  ;;  %829 = vrot.lane.b32.xlu0 %v1442_v18, %s1211_s18 }
 0x114   : > { %853 = vrot.lane.b32.xlu1 %v1440_v17, %s1212_s19  ;;  %851 = vrot.lane.b32.xlu0 %v1442_v18, %s1212_s19 }
 0x118   : > { %821 = vrot.lane.b32.xlu1 %v1440_v17, %s1213_s20  ;;  %819 = vrot.lane.b32.xlu0 %v1442_v18, %s1213_s20 }
 0x11c   : > { %875 = vrot.lane.b32.xlu1 %v1440_v17, %s1214_s21  ;;  %873 = vrot.lane.b32.xlu0 %v1442_v18, %s1214_s21 }
 0x120   : > { %907 = vrot.lane.b32.xlu1 %v1440_v17, %s1215_s22  ;;  %905 = vrot.lane.b32.xlu0 %v1442_v18, %s1215_s22 }
 0x124   : > { %929 = vrot.lane.b32.xlu1 %v1440_v17, %s1216_s23  ;;  %927 = vrot.lane.b32.xlu0 %v1442_v18, %s1216_s23 }
 0x128   : > { %951 = vrot.lane.b32.xlu1 %v1440_v17, %s1217_s24  ;;  %949 = vrot.lane.b32.xlu0 %v1442_v18, %s1217_s24 }
 0x12c   : > { %973 = vrot.lane.b32.xlu1 %v1440_v17, %s1218_s25  ;;  %971 = vrot.lane.b32.xlu0 %v1442_v18, %s1218_s25 }
 0x142   : > { %v497_v21 = vpop.permute.xlu1 %496  ;;  %v495_v22 = vpop.permute.xlu0 %494 }
 0x143   : > { %v499_v23 = vsel %vm498_vm6, %v495_v22, %v497_v21  ;;  %v500_v24 = vsel %vm498_vm6, %v497_v21, %v495_v22 }
 0x144   : > { %v503_v33 = vrot.slane %v500_v24, 7  ;;  %v504_v34 = vrot.slane %v499_v23, 7  ;;  %v564_v23 = vmul.f32 %v1501_v40, %v1362_v0  ;;  %v563_v24 = vmul.f32 %v1496_v39, %v1360_v63 }
 0x146   : > { %v668_v25 = vpop.permute.xlu1 %667  ;;  %v666_v26 = vpop.permute.xlu0 %665  ;;  %v507_v41 = vmul.f32 %v503_v33, %v1496_v39  ;;  %v508_v42 = vmul.f32 %v504_v34, %v1501_v40 }
 0x147   : > { %v669_v27 = vsel %vm498_vm6, %v666_v26, %v668_v25  ;;  %v670_v28 = vsel %vm498_vm6, %v668_v25, %v666_v26 }
 0x148   : > { %v511_v49 = vrot.slane %v507_v41, 1  ;;  %v512_v50 = vrot.slane %v508_v42, 1  ;;  %v673_v53 = vrot.slane %v670_v28, 7  ;;  %v674_v54 = vrot.slane %v669_v27, 7 }
 0x14a   : > { %v520_v29 = vpop.permute.xlu1 %519  ;;  %v518_v30 = vpop.permute.xlu0 %517  ;;  %v677_v9 = vmul.f32 %v673_v53, %v1496_v39  ;;  %v678_v10 = vmul.f32 %v674_v54, %v1501_v40 }
 0x14b   : > { %v522_v31 = vsel %vm521_vm7, %v518_v30, %v520_v29  ;;  %v523_v32 = vsel %vm521_vm7, %v520_v29, %v518_v30 }
 0x14c   : > { %v526_v35 = vrot.slane %v523_v32, 6  ;;  %v527_v36 = vrot.slane %v522_v31, 6  ;;  %v681_v29 = vrot.slane %v677_v9, 1  ;;  %v682_v30 = vrot.slane %v678_v10, 1 }
 0x14e   : > { %v690_v37 = vpop.permute.xlu1 %689  ;;  %v688_v38 = vpop.permute.xlu0 %687  ;;  %v530_v43 = vmul.f32 %v526_v35, %v1496_v39  ;;  %v531_v44 = vmul.f32 %v527_v36, %v1501_v40 }
 0x14f   : > { %v691_v61 = vsel %vm521_vm7, %v688_v38, %v690_v37  ;;  %v692_v62 = vsel %vm521_vm7, %v690_v37, %v688_v38  ;;  %v568_v37 = vrot.slane %v564_v23, 4  ;;  %v567_v38 = vrot.slane %v563_v24, 4 }
 0x150   : > { %v534_v55 = vrot.slane %v530_v43, 2  ;;  %v535_v56 = vrot.slane %v531_v44, 2  ;;  %v695_v11 = vrot.slane %v692_v62, 6  ;;  %v696_v12 = vrot.slane %v691_v61, 6 }
 0x152   : > { %v484_v45 = vpop.permute.xlu1 %483  ;;  %v482_v46 = vpop.permute.xlu0 %481  ;;  %v699_v31 = vmul.f32 %v695_v11, %v1496_v39  ;;  %v700_v32 = vmul.f32 %v696_v12, %v1501_v40 }
 0x153   : > { %v488_v47 = vsel %vm487_vm8, %v482_v46, %v484_v45  ;;  %v489_v48 = vsel %vm487_vm8, %v484_v45, %v482_v46 }
 0x154   : > { %v490_v51 = vmul.f32 %v489_v48, %v1496_v39  ;;  %v491_v52 = vmul.f32 %v488_v47, %v1501_v40  ;;  %v731_v47 = vmul.f32 %v1496_v39, %v1368_v1  ;;  %v732_v48 = vmul.f32 %v1501_v40, %v1370_v2 }
 0x156   : > { %v515_v57 = vadd.f32 %v511_v49, %v490_v51  ;;  %v516_v58 = vadd.f32 %v512_v50, %v491_v52  ;;  %v543_v59 = vpop.permute.xlu1 %542  ;;  %v541_v60 = vpop.permute.xlu0 %540  ;;  %v703_v49 = vrot.slane %v699_v31, 2  ;;  %v704_v50 = vrot.slane %v700_v32, 2 }
 0x157   : > { %v545_v3 = vsel %vm544_vm9, %v541_v60, %v543_v59  ;;  %v546_v4 = vsel %vm544_vm9, %v543_v59, %v541_v60  ;;  %v735_v61 = vrot.slane %v731_v47, 4  ;;  %v736_v62 = vrot.slane %v732_v48, 4 }
 0x158   : > { %v538_v5 = vadd.f32 %v534_v55, %v515_v57  ;;  %v539_v6 = vadd.f32 %v535_v56, %v516_v58  ;;  %v549_v7 = vrot.slane %v546_v4, 5  ;;  %v550_v8 = vrot.slane %v545_v3, 5 }
 0x15a   : > { %v553_v13 = vmul.f32 %v549_v7, %v1496_v39  ;;  %v554_v14 = vmul.f32 %v550_v8, %v1501_v40  ;;  %v658_v15 = vpop.permute.xlu1 %657  ;;  %v656_v16 = vpop.permute.xlu0 %655 }
 0x15b   : > { %v659_v21 = vsel %vm487_vm8, %v656_v16, %v658_v15  ;;  %v660_v22 = vsel %vm487_vm8, %v658_v15, %v656_v16 }
 0x15c   : > { %v557_v25 = vrot.slane %v553_v13, 3  ;;  %v558_v26 = vrot.slane %v554_v14, 3  ;;  %v661_v27 = vmul.f32 %v660_v22, %v1496_v39  ;;  %v662_v28 = vmul.f32 %v659_v21, %v1501_v40 }
 0x15e   : > { %v561_v33 = vadd.f32 %v557_v25, %v538_v5  ;;  %v562_v34 = vadd.f32 %v558_v26, %v539_v6  ;;  %v712_v35 = vpop.permute.xlu1 %711  ;;  %v710_v36 = vpop.permute.xlu0 %709  ;;  %v685_v41 = vadd.f32 %v681_v29, %v661_v27  ;;  %v686_v42 = vadd.f32 %v682_v30, %v662_v28 }
 0x15f   : > { %v713_v0 = vsel %vm544_vm9, %v710_v36, %v712_v35  ;;  %v714_v63 = vsel %vm544_vm9, %v712_v35, %v710_v36 }
 0x160   : > { %v717_v43 = vrot.slane %v714_v63, 5  ;;  %v718_v44 = vrot.slane %v713_v0, 5  ;;  %v1543_v45 = vadd.f32 %v568_v37, %v562_v34  ;;  %v1545_v46 = vadd.f32 %v567_v38, %v561_v33 }
 0x161   : > { %v707_v55 = vadd.f32 %v703_v49, %v685_v41  ;;  %v708_v56 = vadd.f32 %v704_v50, %v686_v42 }
 0x162   : > { %v721_v51 = vmul.f32 %v717_v43, %v1496_v39  ;;  %v722_v52 = vmul.f32 %v718_v44, %v1501_v40  ;;  %v576_v53 = vpop.permute.xlu1 %575  ;;  %v574_v54 = vpop.permute.xlu0 %573 }
 0x163   : > { %v578_v3 = vsel %vm577_vm10, %v574_v54, %v576_v53  ;;  %v579_v4 = vsel %vm577_vm10, %v576_v53, %v574_v54 }
 0x164   : > { %v725_v57 = vrot.slane %v721_v51, 3  ;;  %v726_v58 = vrot.slane %v722_v52, 3  ;;  %v582_v11 = vrot.slane %v578_v3, 3  ;;  %v583_v12 = vrot.slane %v579_v4, 3 }
 0x166   : > { %v729_v59 = vadd.f32 %v725_v57, %v707_v55  ;;  %v730_v60 = vadd.f32 %v726_v58, %v708_v56  ;;  %v744_v1 = vpop.permute.xlu1 %743  ;;  %v742_v2 = vpop.permute.xlu0 %741  ;;  %v586_v25 = vmul.f32 %v582_v11, %v1496_v39  ;;  %v587_v26 = vmul.f32 %v583_v12, %v1501_v40 }
 0x167   : > { %v745_v7 = vsel %vm577_vm10, %v742_v2, %v744_v1  ;;  %v746_v8 = vsel %vm577_vm10, %v744_v1, %v742_v2 }
 0x168   : > { %v739_v5 = vadd.f32 %v735_v61, %v729_v59  ;;  %v740_v6 = vadd.f32 %v736_v62, %v730_v60  ;;  %v749_v15 = vrot.slane %v745_v7, 3  ;;  %v750_v16 = vrot.slane %v746_v8, 3 }
 0x169   : > { %v590_v0 = vrot.slane %v586_v25, 5  ;;  %v591_v63 = vrot.slane %v587_v26, 5 }
 0x16a   : > { %v599_v9 = vpop.permute.xlu1 %598  ;;  %v597_v10 = vpop.permute.xlu0 %596  ;;  %v753_v29 = vmul.f32 %v749_v15, %v1496_v39  ;;  %v754_v30 = vmul.f32 %v750_v16, %v1501_v40 }
 0x16b   : > { %v601_v13 = vsel %vm600_vm11, %v597_v10, %v599_v9  ;;  %v602_v14 = vsel %vm600_vm11, %v599_v9, %v597_v10  ;;  %v594_v55 = vadd.f32 %v590_v0, %v1545_v46  ;;  %v595_v56 = vadd.f32 %v591_v63, %v1543_v45  ;;  %v1596_v46 = vld [vmem:[%s1696_s1 + $0x10] sm:$0x1]  ;;  %v1601_v45 = vld [vmem:[%s1696_s1 + $0x18] sm:$0x1] }
 0x16c   : > { %v605_v21 = vrot.slane %v601_v13, 2  ;;  %v606_v22 = vrot.slane %v602_v14, 2  ;;  %v757_v43 = vrot.slane %v753_v29, 5  ;;  %v758_v44 = vrot.slane %v754_v30, 5 }
 0x16e   : > { %v766_v23 = vpop.permute.xlu1 %765  ;;  %v764_v24 = vpop.permute.xlu0 %763  ;;  %v609_v31 = vmul.f32 %v605_v21, %v1496_v39  ;;  %v610_v32 = vmul.f32 %v606_v22, %v1501_v40  ;;  %v761_v62 = vadd.f32 %v757_v43, %v739_v5  ;;  %v762_v2 = vadd.f32 %v758_v44, %v740_v6 }
 0x16f   : > { %v767_v27 = vsel %vm600_vm11, %v764_v24, %v766_v23  ;;  %v768_v28 = vsel %vm600_vm11, %v766_v23, %v764_v24 }
 0x170   : > { %v771_v33 = vrot.slane %v767_v27, 2  ;;  %v772_v34 = vrot.slane %v768_v28, 2  ;;  %v613_v47 = vrot.slane %v609_v31, 6  ;;  %v614_v48 = vrot.slane %v610_v32, 6 }
 0x172   : > { %v622_v35 = vpop.permute.xlu1 %621  ;;  %v620_v36 = vpop.permute.xlu0 %619  ;;  %v775_v49 = vmul.f32 %v771_v33, %v1496_v39  ;;  %v776_v50 = vmul.f32 %v772_v34, %v1501_v40  ;;  %v617_v3 = vadd.f32 %v613_v47, %v594_v55  ;;  %v618_v4 = vadd.f32 %v614_v48, %v595_v56 }
 0x173   : > { %v624_v37 = vsel %vm623_vm12, %v620_v36, %v622_v35  ;;  %v625_v38 = vsel %vm623_vm12, %v622_v35, %v620_v36 }
 0x174   : > { %v628_v41 = vrot.slane %v624_v37, 1  ;;  %v629_v42 = vrot.slane %v625_v38, 1  ;;  %v779_v7 = vrot.slane %v775_v49, 6  ;;  %v780_v8 = vrot.slane %v776_v50, 6 }
 0x176   : > { %v632_v51 = vmul.f32 %v628_v41, %v1496_v39  ;;  %v633_v52 = vmul.f32 %v629_v42, %v1501_v40  ;;  %v788_v53 = vpop.permute.xlu1 %787  ;;  %v786_v54 = vpop.permute.xlu0 %785  ;;  %v783_v23 = vadd.f32 %v779_v7, %v761_v62  ;;  %v784_v24 = vadd.f32 %v780_v8, %v762_v2 }
 0x177   : > { %v789_v57 = vsel %vm623_vm12, %v786_v54, %v788_v53  ;;  %v790_v58 = vsel %vm623_vm12, %v788_v53, %v786_v54 }
 0x178   : > { %v636_v59 = vrot.slane %v632_v51, 7  ;;  %v637_v60 = vrot.slane %v633_v52, 7  ;;  %v793_v1 = vrot.slane %v789_v57, 1  ;;  %v794_v61 = vrot.slane %v790_v58, 1 }
 0x17a   : > { %v797_v9 = vmul.f32 %v793_v1, %v1496_v39  ;;  %v798_v10 = vmul.f32 %v794_v61, %v1501_v40  ;;  %v645_v5 = vpop.permute.xlu1 %644  ;;  %v643_v6 = vpop.permute.xlu0 %642  ;;  %v640_v11 = vadd.f32 %v636_v59, %v617_v3  ;;  %v641_v12 = vadd.f32 %v637_v60, %v618_v4 }
 0x17b   : > { %v647_v13 = vsel %vm646_vm13, %v643_v6, %v645_v5  ;;  %v648_v14 = vsel %vm646_vm13, %v645_v5, %v643_v6 }
 0x17c   : > { %v801_v15 = vrot.slane %v797_v9, 7  ;;  %v802_v16 = vrot.slane %v798_v10, 7  ;;  %v649_v21 = vmul.f32 %v647_v13, %v1596_v46  ;;  %v650_v22 = vmul.f32 %v648_v14, %v1601_v45 }
 0x17e   : > { %v651_v25 = vadd.f32 %v649_v21, %v640_v11  ;;  %v652_v26 = vadd.f32 %v650_v22, %v641_v12  ;;  %v810_v27 = vpop.permute.xlu1 %809  ;;  %v808_v28 = vpop.permute.xlu0 %807  ;;  %v805_v31 = vadd.f32 %v801_v15, %v783_v23  ;;  %v806_v32 = vadd.f32 %v802_v16, %v784_v24 }
 0x17f   : > { %v811_v29 = vsel %vm646_vm13, %v808_v28, %v810_v27  ;;  %v812_v30 = vsel %vm646_vm13, %v810_v27, %v808_v28  ;;  %v896_v28 = vmul.f32 %v1501_v40, %v1440_v17 }
 0x180   : > { %v813_v33 = vmul.f32 %v811_v29, %v1596_v46  ;;  %v814_v34 = vmul.f32 %v812_v30, %v1601_v45  ;;  %v653_v35 = vmul.f32 0.11111111, %v651_v25  ;;  %v654_v36 = vmul.f32 0.11111111, %v652_v26 }
 0x181   : > { %v895_v30 = vmul.f32 %v1496_v39, %v1442_v18 }
 0x182   : > { %v815_v0 = vadd.f32 %v813_v33, %v805_v31  ;;  %v816_v63 = vadd.f32 %v814_v34, %v806_v32  ;;  %v832_v37 = vpop.permute.xlu1 %831  ;;  %v830_v38 = vpop.permute.xlu0 %829  ;;  %v985_v49 = vmul.f32 %v653_v35, %v653_v35  ;;  %v986_v50 = vmul.f32 %v654_v36, %v654_v36 }
 0x183   : > { %v833_v41 = vsel %vm498_vm6, %v830_v38, %v832_v37  ;;  %v834_v42 = vsel %vm498_vm6, %v832_v37, %v830_v38 }
 0x184   : > { %v817_v43 = vmul.f32 0.11111111, %v815_v0  ;;  %v818_v44 = vmul.f32 0.11111111, %v816_v63  ;;  %v837_v47 = vrot.slane %v834_v42, 7  ;;  %v838_v48 = vrot.slane %v833_v41, 7 }
 0x186   : > { %v983_v51 = vmul.f32 %v817_v43, %v817_v43  ;;  %v984_v52 = vmul.f32 %v818_v44, %v818_v44  ;;  %v854_v53 = vpop.permute.xlu1 %853  ;;  %v852_v54 = vpop.permute.xlu0 %851  ;;  %v841_v59 = vmul.f32 %v837_v47, %v1496_v39  ;;  %v842_v60 = vmul.f32 %v838_v48, %v1501_v40 }
 0x187   : > { %v855_v55 = vsel %vm521_vm7, %v852_v54, %v854_v53  ;;  %v856_v56 = vsel %vm521_vm7, %v854_v53, %v852_v54  ;;  %v900_v47 = vrot.slane %v896_v28, 4  ;;  %v899_v48 = vrot.slane %v895_v30, 4 }
 0x188   : > { %v1625_v57 = vadd.f32 %v985_v49, %v983_v51  ;;  %v1627_v58 = vadd.f32 %v986_v50, %v984_v52  ;;  %v859_v1 = vrot.slane %v856_v56, 6  ;;  %v860_v61 = vrot.slane %v855_v55, 6 }
 0x189   : > { %v845_v4 = vrot.slane %v841_v59, 1  ;;  %v846_v9 = vrot.slane %v842_v60, 1 }
 0x18a   : > { %v822_v62 = vpop.permute.xlu1 %821  ;;  %v820_v2 = vpop.permute.xlu0 %819  ;;  %v863_v10 = vmul.f32 %v859_v1, %v1496_v39  ;;  %v864_v5 = vmul.f32 %v860_v61, %v1501_v40  ;;  %1177 = vrsqrt.f32 %v1625_v57  ;;  %vm991_vm14 = vcmp.eq.f32.partialorder %v1625_v57, inf }
 0x18b   : > { %v823_v3 = vsel %vm487_vm8, %v820_v2, %v822_v62  ;;  %v824_v7 = vsel %vm487_vm8, %v822_v62, %v820_v2  ;;  %1179 = vrsqrt.f32 %v1627_v58  ;;  %vm998_vm15 = vcmp.eq.f32.partialorder %v1627_v58, inf }
 0x18c   : > { %v826_v8 = vmul.f32 %v823_v3, %v1501_v40  ;;  %v825_v6 = vmul.f32 %v824_v7, %v1496_v39  ;;  %v867_v23 = vrot.slane %v863_v10, 2  ;;  %v868_v24 = vrot.slane %v864_v5, 2 }
 0x18d   : > { %vm993_vm0 = vcmp.eq.f32.partialorder %v1625_v57, 0.0  ;;  %vm1000_vm1 = vcmp.eq.f32.partialorder %v1627_v58, 0.0 }
 0x18e   : > { %v876_v11 = vpop.permute.xlu1 %875  ;;  %v874_v12 = vpop.permute.xlu0 %873  ;;  %v849_v13 = vadd.f32 %v845_v4, %v825_v6  ;;  %v850_v14 = vadd.f32 %v846_v9, %v826_v8 }
 0x18f   : > { %v877_v15 = vsel %vm544_vm9, %v874_v12, %v876_v11  ;;  %v878_v16 = vsel %vm544_vm9, %v876_v11, %v874_v12 }
 0x190   : > { %v881_v21 = vrot.slane %v878_v16, 5  ;;  %v882_v22 = vrot.slane %v877_v15, 5  ;;  %v871_v31 = vadd.f32 %v867_v23, %v849_v13  ;;  %v872_v32 = vadd.f32 %v868_v24, %v850_v14 }
 0x192   : > { %v885_v25 = vmul.f32 %v881_v21, %v1496_v39  ;;  %v886_v26 = vmul.f32 %v882_v22, %v1501_v40  ;;  %v908_v27 = vpop.permute.xlu1 %907  ;;  %v906_v29 = vpop.permute.xlu0 %905 }
 0x193   : > { %v909_v33 = vsel %vm577_vm10, %v906_v29, %v908_v27  ;;  %v910_v34 = vsel %vm577_vm10, %v908_v27, %v906_v29 }
 0x194   : > { %v889_v35 = vrot.slane %v885_v25, 3  ;;  %v890_v36 = vrot.slane %v886_v26, 3  ;;  %v913_v0 = vrot.slane %v909_v33, 3  ;;  %v914_v63 = vrot.slane %v910_v34, 3 }
 0x196   : > { %v893_v37 = vadd.f32 %v889_v35, %v871_v31  ;;  %v894_v38 = vadd.f32 %v890_v36, %v872_v32  ;;  %v917_v17 = vmul.f32 %v913_v0, %v1496_v39  ;;  %v930_v41 = vpop.permute.xlu1 %929  ;;  %v928_v42 = vpop.permute.xlu0 %927  ;;  %v918_v18 = vmul.f32 %v914_v63, %v1501_v40 }
 0x197   : > { %v931_v43 = vsel %vm600_vm11, %v928_v42, %v930_v41  ;;  %v932_v44 = vsel %vm600_vm11, %v930_v41, %v928_v42  ;;  %v1178_v20 = vpop.eup %1177  ;;  %v1219_v32 = vmov 1966171168   ;;  %v1016_v36 = vshrl.u32 %v485_v19, 7 }
 0x198   : > { %v935_v49 = vrot.slane %v931_v43, 2  ;;  %v936_v50 = vrot.slane %v932_v44, 2  ;;  %v904_v51 = vadd.f32 %v900_v47, %v894_v38  ;;  %v903_v52 = vadd.f32 %v899_v48, %v893_v37  ;;  %v1180_v29 = vpop.eup %1179  ;;  %v166_v47 = vld [vmem:[#allocation2] sm:$0x3] }
 0x199   : > { %v921_v53 = vrot.slane %v917_v17, 5  ;;  %v922_v56 = vrot.slane %v918_v18, 5  ;;  %v990_v30 = vmul.f32 %v1178_v20, %v1625_v57  ;;  %v997_v31 = vmul.f32 %v1180_v29, %v1627_v58 }
 0x19a   : > { %v952_v54 = vpop.permute.xlu1 %951  ;;  %v950_v55 = vpop.permute.xlu0 %949  ;;  %v939_v59 = vmul.f32 %v935_v49, %v1496_v39  ;;  %v940_v60 = vmul.f32 %v936_v50, %v1501_v40  ;;  %v1013_v33 = vunpack.c.l.s4 %v1219_v32  ;;  %v1001_v0 = vand.u32 2147483648, %v1627_v58 }
 0x19b   : > { %v953_v1 = vsel %vm623_vm12, %v950_v55, %v952_v54  ;;  %v954_v61 = vsel %vm623_vm12, %v952_v54, %v950_v55  ;;  %v925_v7 = vadd.f32 %v921_v53, %v903_v52  ;;  %v926_v5 = vadd.f32 %v922_v56, %v904_v51 }
 0x19c   : > { %v957_v62 = vrot.slane %v953_v1, 1  ;;  %v943_v2 = vrot.slane %v939_v59, 6  ;;  %v944_v3 = vrot.slane %v940_v60, 6  ;;  %v958_v4 = vrot.slane %v954_v61, 1 }
 0x19d   : > { %v999_v34 = vsel %vm998_vm15, %v1627_v58, %v997_v31  ;;  %v1014_v35 = vunpack.c.0.s8 %v1013_v33 }
 0x19e   : > { %v961_v8 = vmul.f32 %v957_v62, %v1496_v39  ;;  %v974_v9 = vpop.permute.xlu1 %973  ;;  %v972_v10 = vpop.permute.xlu0 %971  ;;  %v962_v6 = vmul.f32 %v958_v4, %v1501_v40  ;;  %v947_v12 = vadd.f32 %v943_v2, %v925_v7  ;;  %v948_v15 = vadd.f32 %v944_v3, %v926_v5 }
 0x19f   : > { %v975_v11 = vsel %vm646_vm13, %v972_v10, %v974_v9  ;;  %v976_v14 = vsel %vm646_vm13, %v974_v9, %v972_v10  ;;  %v1002_v17 = vsel %vm1000_vm1, %v1001_v0, %v999_v34  ;;  %v1017_v42 = vsub.s32 %v1014_v35, %v1016_v36 }
 0x1a0   : > { %v965_v13 = vrot.slane %v961_v8, 7  ;;  %v966_v16 = vrot.slane %v962_v6, 7  ;;  %v977_v21 = vmul.f32 %v975_v11, %v1596_v46  ;;  %v978_v40 = vmul.f32 %v976_v14, %v1601_v45 }
 0x1a1   : > { %v992_v46 = vsel %vm991_vm14, %v1625_v57, %v990_v30  ;;  %v994_v45 = vand.u32 2147483648, %v1625_v57 }
 0x1a2   : > { %v969_v39 = vadd.f32 %v965_v13, %v947_v12  ;;  %v970_v22 = vadd.f32 %v966_v16, %v948_v15 }
 0x1a3   : > { %v995_v37 = vsel %vm993_vm0, %v994_v45, %v992_v46 }
 0x1a4   : > { %v979_v23 = vadd.f32 %v977_v21, %v969_v39  ;;  %v980_v24 = vadd.f32 %v978_v40, %v970_v22 }
 0x1a6   : > { %v981_v25 = vmul.f32 0.11111111, %v979_v23  ;;  %v982_v26 = vmul.f32 0.11111111, %v980_v24 }
 0x1a8   : > { %v1003_v27 = vmax.f32 %v981_v25, 1e-06  ;;  %v1004_v28 = vmax.f32 %v982_v26, 1e-06 }
 0x1aa   : > { %1181 = vrcp.f32 %v1003_v27 }
 0x1ab   : > { %1183 = vrcp.f32 %v1004_v28 }
 0x1b7   : > { %v1182_v63 = vpop.eup %1181 }
 0x1b8   : > { %v1184_v38 = vpop.eup %1183  ;;  %v1006_v41 = vmul.f32 %v1182_v63, %v995_v37 }
 0x1b9   : > { %v1008_v18 = vmul.f32 %v1184_v38, %v1002_v17 }
 0x1bb   : > { %v1011_v43 = vcombine.low %v1006_v41, %v1008_v18 }
 0x1bd   : > { %v1018_v44 = vrot.slane %v1011_v43, %v1017_v42 }
 0x1bf   : > { %v1025_v48 = vrot.slane %v1018_v44, %v1017_v42  ;;  %1036 = sbr.rel (%p1133_p5) target bundleno = 735 (0x2df), region = 40 }
 0x1c1   : > { %v1027_v49 = vadd.f32 %v1025_v48, %v166_v47 }
 0x1c3   : > { %1032 = vst.msk [vmem:[#allocation2] sm:$0x3] %vm1030_vm2, %v1027_v49 }
 0x1c4   : > { %v1041_v50 = vsub.s32 0, %v1016_v36  ;;  %v1045_v51 = vsub.s32 1, %v1016_v36  ;;  %vm1049_vm3 = vcmask 1040384  }
 0x1ca   : > { %v1037_v57 = vld [vmem:[#allocation2] sm:$0x3] }
 0x1cb   : > { %v1042_v58 = vrot.slane %v1037_v57, %v1041_v50  ;;  %v1046_v52 = vrot.slane %v1037_v57, %v1045_v51 }
 0x1cd   : > { %v1050_v53 = vsel %vm1049_vm3, %v1042_v58, 0.0  ;;  %v1051_v54 = vsel %vm1049_vm3, %v1046_v52, 0.0 }
 0x1ce   : > { %v1052_v55 = vadd.f32 %v1051_v54, %v1050_v53 }
 0x1d0   : > { %1053 = vadd.xlane.f32.xlu0 %v1052_v55 }
 0x259   : > { %v1054_v56 = vpop.xlane.xlu0 %1053 }
 0x25a   : > { %v1055_v59 = vrot.slane %v1054_v56, 4 }
 0x25c   : > { %v1056_v60 = vadd.f32 %v1055_v59, %v1054_v56 }
 0x25e   : > { %v1057_v1 = vrot.slane %v1056_v60, 2 }
 0x260   : > { %v1058_v19 = vadd.f32 %v1057_v1, %v1056_v60 }
 0x262   : > { %v1059_v61 = vrot.slane %v1058_v19, 1 }
 0x264   : > { %v1060_v62 = vadd.f32 %v1059_v61, %v1058_v19 }
 0x266   : > { %1140 = vpush %v1060_v62 }
 0x297   : > { %s1141_s7 = spop %1140 }
 0x298   : > { %s1062_s8 = smul.f32 0.001953125, %s1141_s7 }
 0x29a   : > { %s1063_s10 = smax.f32 %s1220_s9, %s1062_s8 }
 0x29b   : > { %v1064_v2 = vstv %s1063_s10 }
 0x29c   : > { %1185 = vrcp.f32 %v1064_v2 }
 0x2a9   : > { %v1186_v3 = vpop.eup %1185 }
 0x2aa   : > { %1142 = vpush %v1186_v3 }
 0x2db   : > { %s1143_s11 = spop %1142 }
 0x2dc   : > { %s1134_s14 = sadd.f32 -1.0, %s1143_s11 }
 0x2de   : > { %1069 = sst [smem:[#allocation3]] %s1134_s14 }
 0x2df PF: > { %p1148_p6 = scmp.eq.s32.totalorder %s1248_s13, 1  ;;  %s1221_s15 = smov [#allocation3]  }
 0x2e1   : > { %1145 = dma.smem_to_hbm (%p1148_p6), %s1221_s15, 16, %s1698_s3, [#allocation4]  }
 0x2e2   : > { %1202 = dma.done.wait (%p1148_p6), [#allocation4], 16  }
 0x2e3   : > { %1204 = vsyncadd (%p1148_p6), [#allocation4], 4294967280 }
 0x2e4   : > { %1083 = sfence }
 0x2e5 PF: > { %s14_s12 = sadd.s32 1, %s1207_s12  }
 0x2e6   : > { %p11_p7 = scmp.ge.s32.totalorder %s14_s12, 4  }
 0x2e8   :  { %13 = sbr.rel (!%p11_p7) target bundleno = 1 (0x1), region = 69 }
 0x2ed   :  { %1089 = vsyncpa [#allocation4], 1 }
 0x2ee   :  { %1091 = vsyncpa [#allocation4 + $0x1], 1 }

</bundles_post_ra>
